<compile_context>
chip_gen: v6e
topology: v6e:2x2x1
jax: 0.10.0
libtpu: 0.0.40
codegen_flags: <defaults>
</compile_context>

<pallas_src>
import jax
import jax.numpy as jnp
from jax.experimental import pallas as pl
from jax.experimental.pallas import tpu as pltpu


def _attention_kernel(x_ref, w_ref, o_ref):
    # x_ref : (Bt, T, F)  batch tile of the LSTM output (native dtype)
    # w_ref : (1, F)      Linear weight row (scalar bias elided: shift-invariant)
    # o_ref : (Bt, F)     pooled output tile (float32)
    x = x_ref[...].astype(jnp.float32)                       # (Bt, T, F)
    w = w_ref[...].astype(jnp.float32)                       # (1, F)

    # Attention scores, lane-dense (Bt, T): VPU broadcast-multiply + lane
    # reduce over F (N=1 projection does not warrant the MXU).
    scores = jnp.sum(x * w[None, :, :], axis=-1)             # (Bt, T)

    # Numerically stable softmax over the sequence axis (torch dim=1).
    m = jnp.max(scores, axis=-1, keepdims=True)              # (Bt, 1)
    e = jnp.exp(scores - m)                                  # (Bt, T)
    denom = jnp.sum(e, axis=-1, keepdims=True)               # (Bt, 1)
    weights = e / denom                                      # exact divide (mem-bound: free)

    # Weighted sum over T -> (Bt, F).
    T = x.shape[1]
    if T >= 128:
        # Large-T: put the T-contraction on the MXU.
        pooled = jnp.einsum("bt,btf->bf", weights, x,
                            preferred_element_type=jnp.float32)
    else:
        # Small-T (demo shapes): VPU multiply + sublane reduce.
        pooled = jnp.sum(weights[:, :, None] * x, axis=1)    # (Bt, F)

    o_ref[...] = pooled.astype(o_ref.dtype)


def _round_up(n, m):
    return ((n + m - 1) // m) * m


def _choose_block_b(B, T, F, itemsize):
    """Largest batch tile (multiple of 8) whose working set fits the VMEM budget."""
    F_pad = _round_up(max(F, 1), 128)                 # lane padding in VMEM
    # Per batch row: 2 double-buffered input copies (native dtype) plus ~2 f32
    # full-tile elementwise temporaries materialized inside the kernel.
    per_row = T * F_pad * (2 * itemsize + 2 * 4)
    budget = 16 * 1024 * 1024                         # half of the 32 MiB scoped VMEM
    bt = max(8, (budget // per_row) // 8 * 8)
    bt = min(bt, 4096)
    # Keep >= 2 grid steps when B allows so ("parallel",) shards across TCs (v7x).
    if B > 8:
        bt = min(bt, max(8, _round_up(-(-B // 2), 8)))
    # Prefer a tile that divides B so no wrapper-side pad copy is ever needed.
    if B % 8 == 0:
        while bt > 8 and B % bt != 0:
            bt -= 8
    return bt


def attention_forward(lstm_output, weight, bias=None, *, block_b=None):
    """lstm_output: (B, T, 2H); weight: (1, 2H); bias: (1,)  ->  (B, 2H) float32.

    The scalar bias is a mathematical no-op (softmax over the sequence axis is
    shift-invariant), so it is not fed to the kernel.
    """
    del bias
    B, T, F = lstm_output.shape
    itemsize = jnp.dtype(lstm_output.dtype).itemsize
    Bt = block_b if block_b is not None else _choose_block_b(B, T, F, itemsize)
    Bp = _round_up(B, Bt)

    x = lstm_output                    # native dtype: bf16 halves HBM read traffic
    if Bp != B:
        # Rare ragged case (B not a multiple of 8). Zero rows give a uniform
        # softmax over zeros -> zero output rows, sliced off below. No NaNs.
        x = jnp.pad(x, ((0, Bp - B), (0, 0), (0, 0)))
    w_row = weight.reshape(1, F).astype(jnp.float32)

    out = pl.pallas_call(
        _attention_kernel,
        out_shape=jax.ShapeDtypeStruct((Bp, F), jnp.float32),
        grid_spec=pltpu.PrefetchScalarGridSpec(
            num_scalar_prefetch=0,
            grid=(Bp // Bt,),
            in_specs=[
                pl.BlockSpec((Bt, T, F), lambda b: (b, 0, 0)),   # batch tile
                pl.BlockSpec((1, F), lambda b: (0, 0)),          # resident weight
            ],
            out_specs=pl.BlockSpec((Bt, F), lambda b: (b, 0)),
        ),
        compiler_params=pltpu.CompilerParams(
            dimension_semantics=("parallel",),
            vmem_limit_bytes=32 * 1024 * 1024,   # same budget on v5e/v6e/v7x
        ),
    )(x, w_row)

    return out[:B]


def reference_forward(lstm_output, weight, bias):
    # Pure-JAX reference mirroring the PyTorch forward (bias kept here).
    scores = jnp.einsum("btf,of->bto", lstm_output, weight) + bias      # (B, T, 1)
    w = jax.nn.softmax(scores, axis=1)
    return jnp.sum(w * lstm_output, axis=1)                             # (B, 2H)


if __name__ == "__main__":
    hidden_size = 16                       # -> feature dim 2H = 32
    B, T, F = 16, 8, hidden_size * 2       # B=16 -> Bt=8 -> 2 grid steps

    key = jax.random.PRNGKey(0)
    k_x, k_w, k_b = jax.random.split(key, 3)

    lstm_output = jax.random.normal(k_x, (B, T, F), dtype=jnp.float32)

    # Deterministic Linear(2H, 1) params (uniform +-1/sqrt(in_features)).
    bound = 1.0 / jnp.sqrt(jnp.float32(F))
    weight = jax.random.uniform(k_w, (1, F), jnp.float32, -bound, bound)
    bias = jax.random.uniform(k_b, (1,), jnp.float32, -bound, bound)

    out = attention_forward(lstm_output, weight, bias)
    out = jax.block_until_ready(out)

    ref = reference_forward(lstm_output, weight, bias)
    assert out.shape == (B, F)
    assert jnp.allclose(out, ref, atol=1e-3, rtol=1e-3), "mismatch vs reference"

    print("KERNEL_OK")
</pallas_src>

<mosaic_0001>
module attributes {stable_mosaic.version = 11 : i64} {
  func.func @_attention_kernel(%arg0: i32, %arg1: memref<8x8x32xf32, #tpu.memory_space<vmem>>, %arg2: memref<1x32xf32, #tpu.memory_space<vmem>>, %arg3: memref<8x32xf32, #tpu.memory_space<vmem>>) attributes {dimension_semantics = [#tpu.dimension_semantics<parallel>], iteration_bounds = array<i64: 2>, scalar_prefetch = 0 : i64, scratch_operands = 0 : i64, tpu.core_type = #tpu.core_type<tc>, window_params = [{transform_indices = @transform_0, window_bounds = array<i64: 8, 8, 32>}, {pipeline_mode = #tpu.pipeline_mode<synchronous>, transform_indices = @transform_1, window_bounds = array<i64: 1, 32>}, {transform_indices = @transform_2, window_bounds = array<i64: 8, 32>}]} {
    %c0 = arith.constant 0 : index
    %c0_0 = arith.constant 0 : index
    %c0_1 = arith.constant 0 : index
    %0 = vector.load %arg1[%c0, %c0_0, %c0_1] : memref<8x8x32xf32, #tpu.memory_space<vmem>>, vector<8x8x32xf32>
    %c0_2 = arith.constant 0 : index
    %c0_3 = arith.constant 0 : index
    %1 = vector.load %arg2[%c0_2, %c0_3] : memref<1x32xf32, #tpu.memory_space<vmem>>, vector<1x32xf32>
    %2 = vector.shape_cast %1 : vector<1x32xf32> to vector<1x1x32xf32>
    %3 = vector.broadcast %2 : vector<1x1x32xf32> to vector<8x8x32xf32>
    %4 = arith.mulf %0, %3 : vector<8x8x32xf32>
    %cst = arith.constant dense<0.000000e+00> : vector<8x8xf32>
    %5 = vector.multi_reduction <add>, %4, %cst [2] : vector<8x8x32xf32> to vector<8x8xf32>
    %cst_4 = arith.constant dense<0xFF800000> : vector<8xf32>
    %6 = vector.multi_reduction <maximumf>, %5, %cst_4 [1] : vector<8x8xf32> to vector<8xf32>
    %7 = vector.shape_cast %6 : vector<8xf32> to vector<8x1xf32>
    %8 = vector.broadcast %7 : vector<8x1xf32> to vector<8x8xf32>
    %9 = arith.subf %5, %8 : vector<8x8xf32>
    %10 = math.exp %9 : vector<8x8xf32>
    %cst_5 = arith.constant dense<0.000000e+00> : vector<8xf32>
    %11 = vector.multi_reduction <add>, %10, %cst_5 [1] : vector<8x8xf32> to vector<8xf32>
    %12 = vector.shape_cast %11 : vector<8xf32> to vector<8x1xf32>
    %13 = vector.broadcast %12 : vector<8x1xf32> to vector<8x8xf32>
    %14 = arith.divf %10, %13 : vector<8x8xf32>
    %15 = vector.shape_cast %14 : vector<8x8xf32> to vector<8x8x1xf32>
    %16 = vector.broadcast %15 : vector<8x8x1xf32> to vector<8x8x32xf32>
    %17 = arith.mulf %16, %0 : vector<8x8x32xf32>
    %cst_6 = arith.constant dense<0.000000e+00> : vector<8x32xf32>
    %18 = vector.multi_reduction <add>, %17, %cst_6 [1] : vector<8x8x32xf32> to vector<8x32xf32>
    %c0_7 = arith.constant 0 : index
    %c0_8 = arith.constant 0 : index
    %19 = vector.load %arg3[%c0_7, %c0_8] : memref<8x32xf32, #tpu.memory_space<vmem>>, vector<8x32xf32>
    tpu.vector_store %arg3[%c0_7, %c0_8], %18 {strides = array<i32>} : memref<8x32xf32, #tpu.memory_space<vmem>>, vector<8x32xf32>,
    return
  }
  func.func @transform_0(%arg0: i32) -> (i32, i32, i32) {
    %c0_i32 = arith.constant 0 : i32
    %c0_i32_0 = arith.constant 0 : i32
    %c0_i32_1 = arith.constant 0 : i32
    return %arg0, %c0_i32, %c0_i32_0 : i32, i32, i32
  }
  func.func @transform_1(%arg0: i32) -> (i32, i32) {
    %c0_i32 = arith.constant 0 : i32
    %c0_i32_0 = arith.constant 0 : i32
    %c0_i32_1 = arith.constant 0 : i32
    return %c0_i32, %c0_i32_0 : i32, i32
  }
  func.func @transform_2(%arg0: i32) -> (i32, i32) {
    %c0_i32 = arith.constant 0 : i32
    %c0_i32_0 = arith.constant 0 : i32
    return %arg0, %c0_i32 : i32, i32
  }
}

</mosaic_0001>

<bundles_post_ra>
// kernel: tpu_custom_call.1
= control target key start
LH: loop header
LB: loop body
LE: loop exit
PB: predicated region body
PF: predicated region fallthrough
CT: control target
= control target key end

     0   :  { %7 = vsyncpa [#allocation3], 0  ;;  %s1197_s0 = inlined_call_operand.hbm [shape: f32[16,8,32], index: 0, kind: input, shape index: {}]   ;;  %s1198_s1 = inlined_call_operand.vmem [shape: f32[1,32], index: 1, kind: input, shape index: {}]   ;;  %s1199_s2 = inlined_call_operand.hbm [shape: f32[16,32], index: 2, kind: output, shape index: {}]  }
   0x1   :  { %9 = vsyncpa [#allocation3 + $0x1], 0 }
   0x2   :  { %10 = vsyncpa [#allocation4], 0 }
   0x3   :  { %12 = vsyncpa [#allocation4 + $0x1], 0  ;;  %s886_s9 = smov 0   ;;  %s888_s10 = smov 0  }
   0x4   :  { %s890_s11 = smov 0   ;;  %s892_s12 = smov 0  }
   0x5 LB: > { %s907_s13 = sadd.s32 4294967295, %s864_s12   ;;  %s674_s14 = sadd.s32 4294967294, %s864_s12   ;;  %s864_s12 = sphi %s892_s12, %s1214_s12   ;;  %s860_s11 = sphi %s890_s11, %s1213_s11   ;;  %s856_s10 = sphi %s888_s10, %s1212_s10   ;;  %s852_s9 = sphi %s886_s9, %s1211_s9  }
   0x6   : > { %s911_s15 = sadd.s32 1, %s864_s12   ;;  %s25_s16 = sadd.s32 1, %s860_s11 }
   0x7   : > { %s22_s17 = ssub.s32 %s864_s12, %s911_s15  ;;  %p32_p0 = scmp.ne.s32.totalorder %s860_s11, %s856_s10 }
   0x8   : > { %p23_p1 = scmp.eq.s32.totalorder %s22_s17, 0  ;;  %p33_p2 = scmp.eq.s32.totalorder %s864_s12, 0 }
   0x9   : > { %p38_p3 = scmp.ne.s32.totalorder %s856_s10, %s852_s9  ;;  %p39_p4 = scmp.eq.s32.totalorder %s907_s13, 0 }
   0xa   : > { %s923_s18 = scalar_select %p23_p1, %s860_s11, %s25_s16  }
   0xb   : > { %p925_p5 = por %p33_p2, %p32_p0  ;;  %p929_p6 = por %p39_p4, %p38_p3 }
   0xc   : > { %p83_p7 = scmp.eq.s32.totalorder %s907_s13, 1  ;;  %p89_p8 = scmp.eq.s32.totalorder %s674_s14, 1 }
   0xd   : > { %s1203_s20 = scalar_select %p929_p6, 1, 0 }
   0xe   : > { %p701_p10 = scmp.lt.s32.totalorder %s864_s12, 2  ;;  %p936_p11 = por %p83_p7, %p32_p0 }
   0xf   : > { %p940_p12 = por %p89_p8, %p38_p3  ;;  %s112_s23 = sand.u32 1, %s860_s11  }
  0x10   : > { %s1204_s21 = scalar_select %p936_p11, 1, 0 }
  0x11   : > { %s1205_s22 = scalar_select %p940_p12, 1, 0 }
  0x12   : > { %s688_s24 = sshll.u32 %s864_s12, 10  ;;  %s677_s25 = sshll.u32 %s112_s23, 6 }
  0x13   : > { %s949_s28 = scalar_lea.hbm %s1197_s0, %s688_s24  ;;  %s116_s29 = scalar_lea.vmem [#allocation2], %s677_s25 }
  0x14   : > { %s123_s30 = sshll.u32 %s116_s29, 4  ;;  %p953_p13 = pnand %p701_p10, %p925_p5  ;;  %s957_s30 = int_to_ptr.vmem [resolvable:$true] %s123_s30 }
  0x15   : > { %s959_s4 = scalar_lea.sflag [#allocation3], %s112_s23  ;;  %s772_s5 = scalar_lea.hbm %s949_s28, 1024 }
  0x16   : > { %p773_p0 = scmp.ne.s32.totalorder %s949_s28, %s772_s5  ;;  %p774_p1 = pneg %p953_p13 }
  0x17   : > { %s777_s8 = scalar_lea.hbm %s1197_s0, 2048  ;;  %p778_p4 = scmp.lt.s32.totalorder %s949_s28, %s1197_s0 }
  0x18   : > { %p775_p2 = pnand %p774_p1, %p773_p0  ;;  %p779_p5 = scmp.lt.s32.totalorder %s777_s8, %s772_s5 }
  0x1a   : > { %p776_p3 = pneg %p775_p2  ;;  %p780_p7 = por %p779_p5, %p778_p4 }
  0x1c   : > { %p781_p8 = pnand %p780_p7, %p776_p3 }
  0x1e   : > { %784 = shalt.err (!%p781_p8)
}
  0x1f   : > { %s785_s17 = scalar_lea.vmem %s957_s30, 1024  ;;  %s866_s19 = smov [#allocation2]  }
  0x20   : > { %p786_p10 = scmp.ne.s32.totalorder %s957_s30, %s785_s17  ;;  %s790_s23 = sshll.u32 %s866_s19, 4  ;;  %s791_s23 = int_to_ptr.vmem [resolvable:$false] %s790_s23 }
  0x21   : > { %s792_s24 = scalar_lea.vmem %s791_s23, 2048  ;;  %p793_p2 = scmp.lt.s32.totalorder %s957_s30, %s791_s23 }
  0x22   : > { %p788_p9 = pnand %p786_p10, %p774_p1  ;;  %p794_p12 = scmp.lt.s32.totalorder %s792_s24, %s785_s17 }
  0x24   : > { %p789_p0 = pneg %p788_p9  ;;  %p795_p11 = por %p794_p12, %p793_p2 }
  0x26   : > { %p796_p6 = pnand %p795_p11, %p789_p0 }
  0x28   : > { %799 = shalt.err (!%p796_p6)
}
  0x29   : > { %s867_s25 = smov 128   ;;  %s868_s26 = smov 8  }
  0x2a   : > { %696 = dma.hbm_to_vmem [thread:$0]  (!%p953_p13), %s949_s28, 1024, %s957_s30, %s959_s4, %s867_s25, %s867_s25, %s868_s26  }
  0x2b   : > { %p680_p9 = scmp.ge.s32.totalorder %s864_s12, 1  ;;  %p131_p1 = scmp.lt.s32.totalorder %s864_s12, 3 }
  0x2d   : > { %p132_p3 = pnand %p680_p9, %p131_p1 }
  0x2e   : > { %s983_s27 = sand.u32 (!%p132_p3), 1, %s856_s10   ;;  %p1207_p6 = scmp.ne.s32.totalorder (!%p132_p3), %s1203_s20, 0 }
  0x2f   : > { %135 = sbr.rel (%p132_p3) target bundleno = 860 (0x35c), region = 28  ;;  %s681_s29 = sshll.u32 (!%p132_p3), %s983_s27, 6 }
  0x30   : > { %s138_s5 = scalar_lea.sflag (!%p132_p3), [#allocation3], %s983_s27  ;;  %s141_s6 = scalar_lea.vmem (!%p132_p3), [#allocation2], %s681_s29 }
  0x34   : > { %843 = dma.done.wait (%p1207_p6), %s138_s5, 1024  }
  0x35   : > { %845 = vsyncadd (%p1207_p6), %s138_s5, 4294966272  ;;  %v991_v0 = vld [vmem:[%s141_s6] sm:$0xff]  ;;  %vm186_vm0 = vcmask 261120   ;;  %v996_v2 = vld [vmem:[%s141_s6 + $0x10] sm:$0xff]  ;;  %v219_v25 = vlaneseq  ;;  %vm253_vm1 = vcmask 1041409   ;;  %vm255_vm2 = vcmask 1042434  }
  0x36   : > { %v683_v1 = vld [vmem:[%s1198_s1] ss:$0 sm:$0xff]  ;;  %v1000_v5 = vld [vmem:[%s141_s6 + $0x8] sm:$0xff]  ;;  %v1002_v6 = vld [vmem:[%s141_s6 + $0x18] sm:$0xff]  ;;  %vm257_vm3 = vcmask 1043459   ;;  %vm259_vm4 = vcmask 1044484  }
  0x37   : > { %v178_v3 = vmul.f32 %v683_v1, %v991_v0  ;;  %v180_v4 = vmul.f32 %v683_v1, %v996_v2  ;;  %v179_v7 = vmul.f32 %v683_v1, %v1000_v5  ;;  %v181_v8 = vmul.f32 %v683_v1, %v1002_v6  ;;  %v1006_v9 = vld [vmem:[%s141_s6 + $0x20] sm:$0xff]  ;;  %v1008_v10 = vld [vmem:[%s141_s6 + $0x28] sm:$0xff]  ;;  %v1016_v17 = vld [vmem:[%s141_s6 + $0x30] sm:$0xff]  ;;  %s682_s20 = sshll.u32 %s983_s27, 3  ;;  %s685_s3 = sshll.u32 %s907_s13, 7 }
  0x38   : > { %v182_v15 = vmul.f32 %v683_v1, %v1006_v9  ;;  %v183_v16 = vmul.f32 %v683_v1, %v1008_v10  ;;  %v1018_v18 = vld [vmem:[%s141_s6 + $0x38] sm:$0xff]  ;;  %v184_v21 = vmul.f32 %v683_v1, %v1016_v17  ;;  %v220_v26 = vand.u32 127, %v219_v25  ;;  %s161_s4 = scalar_lea.vmem [#allocation5], %s682_s20  ;;  %s1158_s16 = scalar_lea.hbm %s1199_s2, %s685_s3 }
  0x39   : > { %v187_v11 = vsel %vm186_vm0, %v178_v3, 0.0  ;;  %v193_v12 = vsel %vm186_vm0, %v180_v4, 0.0  ;;  %v190_v13 = vsel %vm186_vm0, %v179_v7, 0.0  ;;  %v196_v14 = vsel %vm186_vm0, %v181_v8, 0.0  ;;  %s604_s7 = sshll.u32 %s161_s4, 4  ;;  %s591_s13 = scalar_lea.sflag [#allocation4], %s983_s27  ;;  %s605_s7 = int_to_ptr.vmem [resolvable:$true] %s604_s7 }
  0x3a   : > { %188 = vadd.xlane.f32.xlu0 %v187_v11  ;;  %194 = vadd.xlane.f32.xlu1 %v193_v12  ;;  %v199_v19 = vsel %vm186_vm0, %v182_v15, 0.0  ;;  %v202_v20 = vsel %vm186_vm0, %v183_v16, 0.0  ;;  %v185_v22 = vmul.f32 %v683_v1, %v1018_v18  ;;  %v205_v23 = vsel %vm186_vm0, %v184_v21, 0.0  ;;  %s800_s17 = scalar_lea.vmem %s605_s7, 128  ;;  %p1208_p12 = scmp.ne.s32.totalorder %s1204_s21, 0 }
  0x3b   : > { %v1026_v27 = vshrl.u32 %v219_v25, 7  ;;  %vm261_vm5 = vcmask 1045509   ;;  %vm263_vm6 = vcmask 1046534   ;;  %vm265_vm7 = vcmask 1047559   ;;  %p801_p11 = scmp.ne.s32.totalorder %s605_s7, %s800_s17  ;;  %s870_s19 = smov [#allocation5]  }
  0x3c   : > { %v208_v24 = vsel %vm186_vm0, %v185_v22, 0.0  ;;  %vm268_vm8 = vcmask 64512   ;;  %v869_v53 = vmov 0   ;;  %s804_s23 = sshll.u32 %s870_s19, 4  ;;  %s805_s23 = int_to_ptr.vmem [resolvable:$false] %s804_s23 }
  0x3d   : > { %v1029_v30 = vsub.s32 %v220_v26, %v1026_v27  ;;  %739 = vset.pattern.permute.xlu0 %v869_v53  ;;  %738 = vset.pattern.permute.xlu1 %v869_v53  ;;  %v275_v54 = vsub.s32 0, %v1026_v27  ;;  %v279_v55 = vsub.s32 1, %v1026_v27  ;;  %v283_v56 = vsub.s32 2, %v1026_v27  ;;  %p802_p13 = pnand %p801_p11, %p1208_p12  ;;  %s806_s24 = scalar_lea.vmem %s805_s23, 256 }
  0x3e   : > { %191 = vadd.xlane.f32.xlu0 %v190_v13  ;;  %197 = vadd.xlane.f32.xlu1 %v196_v14  ;;  %v287_v57 = vsub.s32 3, %v1026_v27  ;;  %v291_v62 = vsub.s32 4, %v1026_v27  ;;  %v295_v11 = vsub.s32 5, %v1026_v27  ;;  %v299_v15 = vsub.s32 6, %v1026_v27  ;;  %p807_p5 = scmp.lt.s32.totalorder %s605_s7, %s805_s23  ;;  %p808_p7 = scmp.lt.s32.totalorder %s806_s24, %s800_s17 }
  0x3f   : > { %v303_v21 = vsub.s32 7, %v1026_v27  ;;  %p803_p4 = pneg %p802_p13 }
  0x40   : > { %p809_p8 = por %p808_p7, %p807_p5 }
  0x42   : > { %200 = vadd.xlane.f32.xlu0 %v199_v19  ;;  %203 = vadd.xlane.f32.xlu1 %v202_v20  ;;  %p810_p10 = pnand %p809_p8, %p803_p4 }
  0x46   : > { %206 = vadd.xlane.f32.xlu0 %v205_v23  ;;  %209 = vadd.xlane.f32.xlu1 %v208_v24 }
  0xc3   : > { %v189_v28 = vpop.xlane.xlu0 %188  ;;  %v195_v29 = vpop.xlane.xlu1 %194 }
  0xc4   : > { %v224_v33 = vrot.slane %v189_v28, %v1029_v30  ;;  %v232_v36 = vrot.slane %v195_v29, %v1029_v30 }
  0xc7   : > { %v192_v31 = vpop.xlane.xlu0 %191  ;;  %v198_v32 = vpop.xlane.xlu1 %197 }
  0xc8   : > { %v228_v34 = vrot.slane %v192_v31, %v1029_v30  ;;  %v236_v35 = vrot.slane %v198_v32, %v1029_v30 }
  0xca   : > { %v254_v37 = vsel %vm253_vm1, %v228_v34, %v224_v33 }
  0xcb   : > { %v256_v38 = vsel %vm255_vm2, %v232_v36, %v254_v37  ;;  %v201_v39 = vpop.xlane.xlu0 %200  ;;  %v204_v40 = vpop.xlane.xlu1 %203 }
  0xcc   : > { %v258_v41 = vsel %vm257_vm3, %v236_v35, %v256_v38  ;;  %v240_v42 = vrot.slane %v201_v39, %v1029_v30  ;;  %v244_v43 = vrot.slane %v204_v40, %v1029_v30 }
  0xce   : > { %v260_v44 = vsel %vm259_vm4, %v240_v42, %v258_v41 }
  0xcf   : > { %v207_v45 = vpop.xlane.xlu0 %206  ;;  %v210_v46 = vpop.xlane.xlu1 %209  ;;  %v262_v49 = vsel %vm261_vm5, %v244_v43, %v260_v44 }
  0xd0   : > { %v248_v47 = vrot.slane %v207_v45, %v1029_v30  ;;  %v252_v48 = vrot.slane %v210_v46, %v1029_v30 }
  0xd2   : > { %v264_v50 = vsel %vm263_vm6, %v248_v47, %v262_v49 }
  0xd3   : > { %v266_v51 = vsel %vm265_vm7, %v252_v48, %v264_v50 }
  0xd4   : > { %v269_v52 = vsel %vm268_vm8, %v266_v51, -inf }
  0xd5   : > { %270 = vmax.xlane.f32.xlu0 %v269_v52 }
 0x15e   : > { %v271_v58 = vpop.xlane.xlu0 %270 }
 0x15f   : > { %v276_v59 = vrot.slane %v271_v58, %v275_v54  ;;  %v280_v60 = vrot.slane %v271_v58, %v279_v55  ;;  %v284_v61 = vrot.slane %v271_v58, %v283_v56  ;;  %v288_v63 = vrot.slane %v271_v58, %v287_v57 }
 0x160   : > { %v292_v12 = vrot.slane %v271_v58, %v291_v62  ;;  %v296_v16 = vrot.slane %v271_v58, %v295_v11  ;;  %v300_v22 = vrot.slane %v271_v58, %v299_v15  ;;  %v304_v25 = vrot.slane %v271_v58, %v303_v21 }
 0x161   : > { %v313_v1 = vsub.f32 %v189_v28, %v276_v59  ;;  %v314_v3 = vsub.f32 %v192_v31, %v280_v60  ;;  %v315_v4 = vsub.f32 %v195_v29, %v284_v61  ;;  %v316_v13 = vsub.f32 %v198_v32, %v288_v63 }
 0x162   : > { %v317_v19 = vsub.f32 %v201_v39, %v292_v12  ;;  %v318_v23 = vsub.f32 %v204_v40, %v296_v16  ;;  %v319_v26 = vsub.f32 %v207_v45, %v300_v22  ;;  %v320_v32 = vsub.f32 %v210_v46, %v304_v25 }
 0x163   : > { %v321_v7 = vmul.f32 1.442695, %v313_v1  ;;  %v323_v8 = vmul.f32 1.442695, %v314_v3  ;;  %v325_v14 = vmul.f32 1.442695, %v315_v4 }
 0x164   : > { %v327_v20 = vmul.f32 1.442695, %v316_v13  ;;  %v329_v24 = vmul.f32 1.442695, %v317_v19  ;;  %v331_v28 = vmul.f32 1.442695, %v318_v23 }
 0x165   : > { %740 = vpow2.f32 %v321_v7  ;;  %v333_v33 = vmul.f32 1.442695, %v319_v26  ;;  %v335_v35 = vmul.f32 1.442695, %v320_v32 }
 0x166   : > { %742 = vpow2.f32 %v323_v8 }
 0x167   : > { %744 = vpow2.f32 %v325_v14 }
 0x168   : > { %746 = vpow2.f32 %v327_v20 }
 0x169   : > { %748 = vpow2.f32 %v329_v24 }
 0x16a   : > { %750 = vpow2.f32 %v331_v28 }
 0x16b   : > { %752 = vpow2.f32 %v333_v33 }
 0x16c   : > { %754 = vpow2.f32 %v335_v35 }
 0x172   : > { %v741_v29 = vpop.eup %740 }
 0x173   : > { %v1071_v31 = vpop.eup %742  ;;  %346 = vperm.xlu1 %738, %v741_v29  }
 0x174   : > { %349 = vperm.xlu0 %739, %v1071_v31   ;;  %v1074_v34 = vpop.eup %744 }
 0x175   : > { %v1077_v36 = vpop.eup %746 }
 0x176   : > { %v1080_v37 = vpop.eup %748 }
 0x177   : > { %352 = vperm.xlu1 %738, %v1074_v34   ;;  %v1083_v38 = vpop.eup %750 }
 0x178   : > { %v1086_v39 = vpop.eup %752 }
 0x179   : > { %v1089_v40 = vpop.eup %754 }
 0x17b   : > { %355 = vperm.xlu1 %738, %v1077_v36  }
 0x17f   : > { %358 = vperm.xlu1 %738, %v1080_v37  }
 0x183   : > { %361 = vperm.xlu1 %738, %v1083_v38  }
 0x187   : > { %364 = vperm.xlu1 %738, %v1086_v39  }
 0x18b   : > { %367 = vperm.xlu1 %738, %v1089_v40  }
 0x1ee   : > { %v347_v41 = vpop.permute.xlu1 %346 }
 0x1ef   : > { %v350_v45 = vpop.permute.xlu0 %349  ;;  %v372_v48 = vrot.slane %v347_v41, %v1029_v30 }
 0x1f0   : > { %v376_v47 = vrot.slane %v350_v45, %v1029_v30 }
 0x1f2   : > { %v353_v42 = vpop.permute.xlu1 %352  ;;  %v401_v53 = vsel %vm253_vm1, %v376_v47, %v372_v48 }
 0x1f3   : > { %v380_v49 = vrot.slane %v353_v42, %v1029_v30 }
 0x1f5   : > { %v402_v59 = vsel %vm255_vm2, %v380_v49, %v401_v53 }
 0x1f6   : > { %v356_v43 = vpop.permute.xlu1 %355 }
 0x1f7   : > { %v384_v50 = vrot.slane %v356_v43, %v1029_v30 }
 0x1f9   : > { %v403_v61 = vsel %vm257_vm3, %v384_v50, %v402_v59 }
 0x1fa   : > { %v359_v44 = vpop.permute.xlu1 %358 }
 0x1fb   : > { %v388_v51 = vrot.slane %v359_v44, %v1029_v30 }
 0x1fd   : > { %v404_v63 = vsel %vm259_vm4, %v388_v51, %v403_v61 }
 0x1fe   : > { %v362_v46 = vpop.permute.xlu1 %361 }
 0x1ff   : > { %v392_v58 = vrot.slane %v362_v46, %v1029_v30 }
 0x201   : > { %v405_v3 = vsel %vm261_vm5, %v392_v58, %v404_v63 }
 0x202   : > { %v365_v52 = vpop.permute.xlu1 %364 }
 0x203   : > { %v396_v60 = vrot.slane %v365_v52, %v1029_v30 }
 0x205   : > { %v406_v7 = vsel %vm263_vm6, %v396_v60, %v405_v3 }
 0x206   : > { %v368_v1 = vpop.permute.xlu1 %367 }
 0x207   : > { %v400_v4 = vrot.slane %v368_v1, %v1029_v30 }
 0x209   : > { %v407_v8 = vsel %vm265_vm7, %v400_v4, %v406_v7 }
 0x20a   : > { %v409_v12 = vsel %vm268_vm8, %v407_v8, 0.0 }
 0x20b   : > { %410 = vadd.xlane.f32.xlu1 %v409_v12 }
 0x294   : > { %v411_v13 = vpop.xlane.xlu1 %410 }
 0x295   : > { %v416_v14 = vrot.slane %v411_v13, %v275_v54  ;;  %v420_v16 = vrot.slane %v411_v13, %v279_v55  ;;  %v424_v19 = vrot.slane %v411_v13, %v283_v56  ;;  %v428_v30 = vrot.slane %v411_v13, %v287_v57 }
 0x296   : > { %v432_v20 = vrot.slane %v411_v13, %v291_v62  ;;  %v436_v54 = vrot.slane %v411_v13, %v295_v11  ;;  %v440_v56 = vrot.slane %v411_v13, %v299_v15  ;;  %v444_v62 = vrot.slane %v411_v13, %v303_v21 }
 0x297   : > { %756 = vrcp.f32 %v416_v14 }
 0x298   : > { %758 = vrcp.f32 %v420_v16 }
 0x299   : > { %760 = vrcp.f32 %v424_v19 }
 0x29a   : > { %762 = vrcp.f32 %v428_v30 }
 0x29b   : > { %764 = vrcp.f32 %v432_v20 }
 0x29c   : > { %766 = vrcp.f32 %v436_v54 }
 0x29d   : > { %768 = vrcp.f32 %v440_v56 }
 0x29e   : > { %770 = vrcp.f32 %v444_v62 }
 0x2a4   : > { %v757_v22 = vpop.eup %756 }
 0x2a5   : > { %v454_v23 = vmul.f32 %v757_v22, %v741_v29  ;;  %v759_v55 = vpop.eup %758 }
 0x2a6   : > { %v456_v24 = vmul.f32 %v759_v55, %v1071_v31  ;;  %v761_v57 = vpop.eup %760 }
 0x2a7   : > { %471 = vperm.xlu0 %739, %v454_v23   ;;  %v458_v25 = vmul.f32 %v761_v57, %v1074_v34  ;;  %v763_v26 = vpop.eup %762 }
 0x2a8   : > { %v460_v11 = vmul.f32 %v763_v26, %v1077_v36  ;;  %v765_v28 = vpop.eup %764 }
 0x2a9   : > { %v462_v15 = vmul.f32 %v765_v28, %v1080_v37  ;;  %v767_v29 = vpop.eup %766 }
 0x2aa   : > { %v464_v31 = vmul.f32 %v767_v29, %v1083_v38  ;;  %v769_v32 = vpop.eup %768 }
 0x2ab   : > { %476 = vperm.xlu0 %739, %v456_v24   ;;  %v466_v27 = vmul.f32 %v769_v32, %v1086_v39  ;;  %v771_v21 = vpop.eup %770 }
 0x2ac   : > { %v468_v33 = vmul.f32 %v771_v21, %v1089_v40 }
 0x2af   : > { %481 = vperm.xlu0 %739, %v458_v25  }
 0x2b3   : > { %486 = vperm.xlu0 %739, %v460_v11  }
 0x2b7   : > { %491 = vperm.xlu0 %739, %v462_v15  }
 0x2bb   : > { %496 = vperm.xlu0 %739, %v464_v31  }
 0x2bf   : > { %501 = vperm.xlu0 %739, %v466_v27  }
 0x2c3   : > { %506 = vperm.xlu0 %739, %v468_v33  }
 0x322   : > { %v472_v34 = vpop.permute.xlu0 %471 }
 0x323   : > { %v509_v37 = vmul.f32 %v472_v34, %v991_v0 }
 0x325   : > { %v517_v39 = vsel %vm186_vm0, %v509_v37, 0.0 }
 0x326   : > { %v477_v35 = vpop.permute.xlu0 %476  ;;  %v518_v48 = vrot.slane %v517_v39, 4 }
 0x327   : > { %v510_v36 = vmul.f32 %v477_v35, %v1000_v5 }
 0x328   : > { %v519_v52 = vadd.f32 %v518_v48, %v517_v39 }
 0x329   : > { %v524_v38 = vsel %vm186_vm0, %v510_v36, 0.0 }
 0x32a   : > { %v482_v41 = vpop.permute.xlu0 %481  ;;  %v525_v40 = vrot.slane %v524_v38, 4  ;;  %v520_v3 = vrot.slane %v519_v52, 2 }
 0x32b   : > { %v511_v42 = vmul.f32 %v482_v41, %v996_v2 }
 0x32c   : > { %v526_v50 = vadd.f32 %v525_v40, %v524_v38  ;;  %v521_v30 = vadd.f32 %v520_v3, %v519_v52 }
 0x32d   : > { %v531_v43 = vsel %vm186_vm0, %v511_v42, 0.0 }
 0x32e   : > { %v487_v44 = vpop.permute.xlu0 %486  ;;  %v532_v46 = vrot.slane %v531_v43, 4  ;;  %v522_v25 = vrot.slane %v521_v30, 1 }
 0x32f   : > { %v512_v45 = vmul.f32 %v487_v44, %v1002_v6  ;;  %v527_v6 = vrot.slane %v526_v50, 2 }
 0x330   : > { %v533_v2 = vadd.f32 %v532_v46, %v531_v43  ;;  %v523_v33 = vadd.f32 %v522_v25, %v521_v30 }
 0x331   : > { %v538_v47 = vsel %vm186_vm0, %v512_v45, 0.0  ;;  %v528_v13 = vadd.f32 %v527_v6, %v526_v50 }
 0x332   : > { %v539_v5 = vrot.slane %v538_v47, 4  ;;  %v492_v49 = vpop.permute.xlu0 %491  ;;  %v534_v63 = vrot.slane %v533_v2, 2 }
 0x333   : > { %v513_v0 = vmul.f32 %v492_v49, %v1006_v9  ;;  %v529_v56 = vrot.slane %v528_v13, 1 }
 0x334   : > { %v540_v53 = vadd.f32 %v539_v5, %v538_v47  ;;  %v535_v16 = vadd.f32 %v534_v63, %v533_v2 }
 0x335   : > { %v545_v51 = vsel %vm186_vm0, %v513_v0, 0.0  ;;  %v530_v29 = vadd.f32 %v529_v56, %v528_v13 }
 0x336   : > { %v546_v58 = vrot.slane %v545_v51, 4  ;;  %v497_v59 = vpop.permute.xlu0 %496  ;;  %v541_v4 = vrot.slane %v540_v53, 2  ;;  %v536_v62 = vrot.slane %v535_v16, 1 }
 0x337   : > { %v514_v60 = vmul.f32 %v497_v59, %v1008_v10  ;;  %v581_v41 = vsel %vm253_vm1, %v530_v29, %v523_v33 }
 0x338   : > { %v547_v61 = vadd.f32 %v546_v58, %v545_v51  ;;  %v542_v20 = vadd.f32 %v541_v4, %v540_v53  ;;  %v537_v21 = vadd.f32 %v536_v62, %v535_v16 }
 0x339   : > { %v552_v1 = vsel %vm186_vm0, %v514_v60, 0.0 }
 0x33a   : > { %v553_v7 = vrot.slane %v552_v1, 4  ;;  %v502_v8 = vpop.permute.xlu0 %501  ;;  %v548_v9 = vrot.slane %v547_v61, 2  ;;  %v543_v26 = vrot.slane %v542_v20, 1  ;;  %v582_v38 = vsel %vm255_vm2, %v537_v21, %v581_v41 }
 0x33b   : > { %v515_v12 = vmul.f32 %v502_v8, %v1016_v17 }
 0x33c   : > { %v554_v14 = vadd.f32 %v553_v7, %v552_v1  ;;  %v549_v23 = vadd.f32 %v548_v9, %v547_v61 }
 0x33d   : > { %v559_v19 = vsel %vm186_vm0, %v515_v12, 0.0 }
 0x33e   : > { %v555_v10 = vrot.slane %v554_v14, 2  ;;  %v560_v22 = vrot.slane %v559_v19, 4  ;;  %v507_v54 = vpop.permute.xlu0 %506  ;;  %v550_v15 = vrot.slane %v549_v23, 1 }
 0x33f   : > { %v516_v55 = vmul.f32 %v507_v54, %v1018_v18  ;;  %v544_v18 = vadd.f32 %v543_v26, %v542_v20 }
 0x340   : > { %v556_v24 = vadd.f32 %v555_v10, %v554_v14  ;;  %v561_v57 = vadd.f32 %v560_v22, %v559_v19  ;;  %v551_v36 = vadd.f32 %v550_v15, %v549_v23 }
 0x341   : > { %v566_v17 = vsel %vm186_vm0, %v516_v55, 0.0  ;;  %v583_v44 = vsel %vm257_vm3, %v544_v18, %v582_v38 }
 0x342   : > { %v562_v11 = vrot.slane %v561_v57, 2  ;;  %v567_v28 = vrot.slane %v566_v17, 4  ;;  %v557_v31 = vrot.slane %v556_v24, 1  ;;  %v584_v45 = vsel %vm259_vm4, %v551_v36, %v583_v44 }
 0x344   : > { %v563_v32 = vadd.f32 %v562_v11, %v561_v57  ;;  %v568_v27 = vadd.f32 %v567_v28, %v566_v17  ;;  %v558_v37 = vadd.f32 %v557_v31, %v556_v24 }
 0x346   : > { %v564_v34 = vrot.slane %v563_v32, 1  ;;  %v569_v35 = vrot.slane %v568_v27, 2  ;;  %v585_v40 = vsel %vm261_vm5, %v558_v37, %v584_v45 }
 0x348   : > { %v570_v42 = vadd.f32 %v569_v35, %v568_v27  ;;  %v565_v43 = vadd.f32 %v564_v34, %v563_v32 }
 0x34a   : > { %v571_v39 = vrot.slane %v570_v42, 1  ;;  %v586_v47 = vsel %vm263_vm6, %v565_v43, %v585_v40 }
 0x34c   : > { %v572_v46 = vadd.f32 %v571_v39, %v570_v42 }
 0x34e   : > { %v587_v48 = vsel %vm265_vm7, %v572_v46, %v586_v47 }
 0x34f   : > { %589 = vst.msk [vmem:[%s161_s4] sm:$0xff] %vm186_vm0, %v587_v48 }
 0x350   : > { %813 = shalt.err (!%p810_p10)
}
 0x351   : > { %s814_s25 = scalar_lea.hbm %s1158_s16, 128  ;;  %s818_s29 = scalar_lea.hbm %s1199_s2, 256 }
 0x352   : > { %p815_p0 = scmp.ne.s32.totalorder %s1158_s16, %s814_s25  ;;  %p819_p1 = scmp.lt.s32.totalorder %s1158_s16, %s1199_s2 }
 0x353   : > { %p820_p3 = scmp.lt.s32.totalorder %s818_s29, %s814_s25 }
 0x354   : > { %p816_p2 = pnand %p815_p0, %p1208_p12 }
 0x355   : > { %p821_p6 = por %p820_p3, %p819_p1 }
 0x356   : > { %p817_p9 = pneg %p816_p2 }
 0x358   : > { %p822_p11 = pnand %p821_p6, %p817_p9 }
 0x35a   : > { %825 = shalt.err (!%p822_p11)
}
 0x35b   : > { %691 = dma.vmem_to_hbm [thread:$0]  (%p1208_p12), %s605_s7, 128, %s1158_s16, %s591_s13  }
 0x35c PF: > { %s616_s28 = sand.u32 1, %s852_s9   ;;  %p1209_p13 = scmp.ne.s32.totalorder %s1205_s22, 0 }
 0x35d   : > { %p1210_p4 = scmp.ge.s32.totalorder %s864_s12, 2  ;;  %s617_s30 = scalar_lea.sflag [#allocation4], %s616_s28 }
 0x35f   : > { %p698_p5 = pnand %p1210_p4, %p1209_p13 }
 0x361   : > { %p699_p7 = pneg %p698_p5 }
 0x363   : > { %847 = dma.done.wait (%p699_p7), %s617_s30, 128  }
 0x364   : > { %849 = vsyncadd (%p699_p7), %s617_s30, 4294967168  ;;  %p15_p8 = scmp.ge.s32.totalorder %s911_s15, 4   ;;  %s1211_s9 = smov %s856_s10 }
 0x365   : > { %s1212_s10 = smov %s860_s11  ;;  %s1213_s11 = smov %s923_s18 }
 0x366   : > { %s1214_s12 = smov %s911_s15  ;;  %17 = sbr.rel (!%p15_p8) target bundleno = 5 (0x5), region = 73 }
 0x36b   :  { %622 = vsyncpa [#allocation3], 1 }
 0x36c   :  { %624 = vsyncpa [#allocation3 + $0x1], 1 }
 0x36d   :  { %625 = vsyncpa [#allocation4], 1 }
 0x36e   :  { %627 = vsyncpa [#allocation4 + $0x1], 1 }

</bundles_post_ra>
